<compile_context>
chip_gen: v6e
topology: v6e:2x2x1
jax: 0.10.0
libtpu: 0.0.40
codegen_flags: <defaults>
</compile_context>

<pallas_src>
import math
import functools

import jax
import jax.numpy as jnp
from jax.experimental import pallas as pl
from jax.experimental.pallas import tpu as pltpu


# ----------------------------- config -----------------------------------
class CLIPConfig:
    hidden_size = 32
    intermediate_size = 128


# ----------------------------- kernel ------------------------------------
def _gelu_exact(x):
    # nn.GELU() default = exact (erf) GELU
    return 0.5 * x * (1.0 + jax.lax.erf(x * (1.0 / math.sqrt(2.0))))


def clip_mlp_kernel(x_ref, fc1w_ref, fc1b_ref, fc2w_ref, fc2b_ref, out_ref):
    x = x_ref[...].astype(jnp.float32)                               # (R_t, E)
    h = jnp.dot(x, fc1w_ref[...],
                preferred_element_type=jnp.float32) + fc1b_ref[0, :]  # (R_t, I)
    h = _gelu_exact(h)
    y = jnp.dot(h, fc2w_ref[...],
                preferred_element_type=jnp.float32) + fc2b_ref[0, :]  # (R_t, E)
    out_ref[...] = y.astype(out_ref.dtype)


# ----------------------------- wrapper ------------------------------------
def _pick_row_tile(num_rows, max_tile=1024):
    """Largest row tile <= max_tile that evenly divides num_rows (mult of 8)."""
    if num_rows <= max_tile:
        return num_rows
    for t in range(max_tile - (max_tile % 8), 7, -8):
        if num_rows % t == 0:
            return t
    return num_rows  # fallback: single tile


def clip_mlp(hidden_states, params, config):
    B, S, E = hidden_states.shape
    I = config.intermediate_size

    R = B * S
    x2d = hidden_states.reshape(R, E)     # fold batch into rows (free reshape)
    tile_r = _pick_row_tile(R)
    grid = (R // tile_r,)

    def replicated(shape):
        return pl.BlockSpec(shape, lambda r: (0,) * len(shape))

    out2d = pl.pallas_call(
        clip_mlp_kernel,
        out_shape=jax.ShapeDtypeStruct((R, E), hidden_states.dtype),
        grid_spec=pltpu.PrefetchScalarGridSpec(
            num_scalar_prefetch=0,
            grid=grid,
            in_specs=[
                pl.BlockSpec((tile_r, E), lambda r: (r, 0)),   # activations
                replicated((E, I)),                            # fc1 weight
                replicated((1, I)),                            # fc1 bias
                replicated((I, E)),                            # fc2 weight
                replicated((1, E)),                            # fc2 bias
            ],
            out_specs=pl.BlockSpec((tile_r, E), lambda r: (r, 0)),
        ),
        compiler_params=pltpu.CompilerParams(
            dimension_semantics=("parallel",)),
    )(
        x2d,
        params["fc1_w"], params["fc1_b"],
        params["fc2_w"], params["fc2_b"],
    )
    return out2d.reshape(B, S, E)


# ------------------------- pure-JAX reference ------------------------------
def reference(hidden_states, params):
    h = hidden_states @ params["fc1_w"] + params["fc1_b"][0]
    h = jax.nn.gelu(h, approximate=False)
    h = h @ params["fc2_w"] + params["fc2_b"][0]
    return h


# ------------------------------- main --------------------------------------
if __name__ == "__main__":
    cfg = CLIPConfig()
    B, S, E, I = 2, 8, cfg.hidden_size, cfg.intermediate_size

    key = jax.random.PRNGKey(0)
    ks = jax.random.split(key, 6)

    def lin(k, n_in, n_out):
        # deterministic small-scale init; weight stored as (in, out)
        return 0.05 * jax.random.normal(k, (n_in, n_out), jnp.float32)

    params = {
        "fc1_w": lin(ks[0], E, I),
        "fc1_b": 0.01 * jax.random.normal(ks[1], (1, I), jnp.float32),
        "fc2_w": lin(ks[2], I, E),
        "fc2_b": 0.01 * jax.random.normal(ks[3], (1, E), jnp.float32),
    }

    x = jax.random.normal(ks[4], (B, S, E), jnp.float32)

    out = clip_mlp(x, params, cfg)
    out = jax.block_until_ready(out)

    ref = reference(x, params)
    assert out.shape == (B, S, E)
    assert jnp.allclose(out, ref, atol=1e-5, rtol=1e-5), (
        f"max abs err {jnp.max(jnp.abs(out - ref))}")

    print("KERNEL_OK")
</pallas_src>

<mosaic_0001>
module attributes {stable_mosaic.version = 11 : i64} {
  func.func @clip_mlp_kernel(%arg0: i32, %arg1: memref<16x32xf32, #tpu.memory_space<vmem>>, %arg2: memref<32x128xf32, #tpu.memory_space<vmem>>, %arg3: memref<1x128xf32, #tpu.memory_space<vmem>>, %arg4: memref<128x32xf32, #tpu.memory_space<vmem>>, %arg5: memref<1x32xf32, #tpu.memory_space<vmem>>, %arg6: memref<16x32xf32, #tpu.memory_space<vmem>>) attributes {dimension_semantics = [#tpu.dimension_semantics<parallel>], iteration_bounds = array<i64: 1>, scalar_prefetch = 0 : i64, scratch_operands = 0 : i64, tpu.core_type = #tpu.core_type<tc>, window_params = [{transform_indices = @transform_0, window_bounds = array<i64: 16, 32>}, {pipeline_mode = #tpu.pipeline_mode<synchronous>, transform_indices = @transform_1, window_bounds = array<i64: 32, 128>}, {pipeline_mode = #tpu.pipeline_mode<synchronous>, transform_indices = @transform_2, window_bounds = array<i64: 1, 128>}, {pipeline_mode = #tpu.pipeline_mode<synchronous>, transform_indices = @transform_3, window_bounds = array<i64: 128, 32>}, {pipeline_mode = #tpu.pipeline_mode<synchronous>, transform_indices = @transform_4, window_bounds = array<i64: 1, 32>}, {transform_indices = @transform_5, window_bounds = array<i64: 16, 32>}]} {
    %c0 = arith.constant 0 : index
    %c0_0 = arith.constant 0 : index
    %0 = vector.load %arg1[%c0, %c0_0] : memref<16x32xf32, #tpu.memory_space<vmem>>, vector<16x32xf32>
    %c0_1 = arith.constant 0 : index
    %c0_2 = arith.constant 0 : index
    %1 = vector.load %arg2[%c0_1, %c0_2] : memref<32x128xf32, #tpu.memory_space<vmem>>, vector<32x128xf32>
    %cst = arith.constant dense<0.000000e+00> : vector<16x128xf32>
    %2 = tpu.matmul %0, %1, %cst {dimension_numbers = #tpu.dot_dimension_numbers<[1], [0], [0], [1], [0, 0, 1, 1], [], []>} : vector<16x32xf32>, vector<32x128xf32>, vector<16x128xf32> -> vector<16x128xf32>
    %c0_3 = arith.constant 0 : index
    %c0_4 = arith.constant 0 : index
    %3 = vector.load %arg3[%c0_3, %c0_4] : memref<1x128xf32, #tpu.memory_space<vmem>>, vector<1x128xf32>
    %4 = vector.shape_cast %3 : vector<1x128xf32> to vector<128xf32>
    %5 = vector.shape_cast %4 : vector<128xf32> to vector<1x128xf32>
    %6 = vector.broadcast %5 : vector<1x128xf32> to vector<16x128xf32>
    %7 = arith.addf %2, %6 : vector<16x128xf32>
    %cst_5 = arith.constant 5.000000e-01 : f32
    %8 = vector.broadcast %cst_5 : f32 to vector<16x128xf32>
    %9 = arith.mulf %8, %7 : vector<16x128xf32>
    %cst_6 = arith.constant 0.707106769 : f32
    %10 = vector.broadcast %cst_6 : f32 to vector<16x128xf32>
    %11 = arith.mulf %7, %10 : vector<16x128xf32>
    %12 = math.erf %11 : vector<16x128xf32>
    %cst_7 = arith.constant 1.000000e+00 : f32
    %13 = vector.broadcast %cst_7 : f32 to vector<16x128xf32>
    %14 = arith.addf %13, %12 : vector<16x128xf32>
    %15 = arith.mulf %9, %14 : vector<16x128xf32>
    %c0_8 = arith.constant 0 : index
    %c0_9 = arith.constant 0 : index
    %16 = vector.load %arg4[%c0_8, %c0_9] : memref<128x32xf32, #tpu.memory_space<vmem>>, vector<128x32xf32>
    %cst_10 = arith.constant dense<0.000000e+00> : vector<16x32xf32>
    %17 = tpu.matmul %15, %16, %cst_10 {dimension_numbers = #tpu.dot_dimension_numbers<[1], [0], [0], [1], [0, 0, 1, 1], [], []>} : vector<16x128xf32>, vector<128x32xf32>, vector<16x32xf32> -> vector<16x32xf32>
    %c0_11 = arith.constant 0 : index
    %c0_12 = arith.constant 0 : index
    %18 = vector.load %arg5[%c0_11, %c0_12] : memref<1x32xf32, #tpu.memory_space<vmem>>, vector<1x32xf32>
    %19 = vector.shape_cast %18 : vector<1x32xf32> to vector<32xf32>
    %20 = vector.shape_cast %19 : vector<32xf32> to vector<1x32xf32>
    %21 = vector.broadcast %20 : vector<1x32xf32> to vector<16x32xf32>
    %22 = arith.addf %17, %21 : vector<16x32xf32>
    %c0_13 = arith.constant 0 : index
    %c0_14 = arith.constant 0 : index
    %23 = vector.load %arg6[%c0_13, %c0_14] : memref<16x32xf32, #tpu.memory_space<vmem>>, vector<16x32xf32>
    tpu.vector_store %arg6[%c0_13, %c0_14], %22 {strides = array<i32>} : memref<16x32xf32, #tpu.memory_space<vmem>>, vector<16x32xf32>,
    return
  }
  func.func @transform_0(%arg0: i32) -> (i32, i32) {
    %c0_i32 = arith.constant 0 : i32
    %c0_i32_0 = arith.constant 0 : i32
    return %arg0, %c0_i32 : i32, i32
  }
  func.func @transform_1(%arg0: i32) -> (i32, i32) {
    %c0_i32 = arith.constant 0 : i32
    %c0_i32_0 = arith.constant 0 : i32
    %c0_i32_1 = arith.constant 0 : i32
    return %c0_i32, %c0_i32_0 : i32, i32
  }
  func.func @transform_2(%arg0: i32) -> (i32, i32) {
    %c0_i32 = arith.constant 0 : i32
    %c0_i32_0 = arith.constant 0 : i32
    %c0_i32_1 = arith.constant 0 : i32
    return %c0_i32, %c0_i32_0 : i32, i32
  }
  func.func @transform_3(%arg0: i32) -> (i32, i32) {
    %c0_i32 = arith.constant 0 : i32
    %c0_i32_0 = arith.constant 0 : i32
    %c0_i32_1 = arith.constant 0 : i32
    return %c0_i32, %c0_i32_0 : i32, i32
  }
  func.func @transform_4(%arg0: i32) -> (i32, i32) {
    %c0_i32 = arith.constant 0 : i32
    %c0_i32_0 = arith.constant 0 : i32
    %c0_i32_1 = arith.constant 0 : i32
    return %c0_i32, %c0_i32_0 : i32, i32
  }
  func.func @transform_5(%arg0: i32) -> (i32, i32) {
    %c0_i32 = arith.constant 0 : i32
    %c0_i32_0 = arith.constant 0 : i32
    return %arg0, %c0_i32 : i32, i32
  }
}

</mosaic_0001>

<bundles_post_ra>
// kernel: tpu_custom_call.1
= control target key start
LH: loop header
LB: loop body
LE: loop exit
PB: predicated region body
PF: predicated region fallthrough
CT: control target
= control target key end

     0   :  { %vm34_vm0 = vcmask 261120   ;;  %s457_s0 = inlined_call_operand.vmem [shape: f32[16,32], index: 0, kind: input, shape index: {}]   ;;  %s458_s1 = inlined_call_operand.vmem [shape: f32[32,128], index: 1, kind: input, shape index: {}]   ;;  %s459_s2 = inlined_call_operand.vmem [shape: f32[1,128], index: 2, kind: input, shape index: {}]   ;;  %s460_s3 = inlined_call_operand.vmem [shape: f32[128,32], index: 3, kind: input, shape index: {}]   ;;  %s461_s4 = inlined_call_operand.vmem [shape: f32[1,32], index: 4, kind: input, shape index: {}]   ;;  %s462_s5 = inlined_call_operand.hbm [shape: f32[16,32], index: 5, kind: output, shape index: {}]  }
   0x1   :  { %v26_v0 = vld [vmem:[%s458_s1 + $0x18] sm:$0xff]  ;;  %v25_v1 = vld [vmem:[%s458_s1 + $0x10] sm:$0xff]  ;;  %v21_v2 = vld [vmem:[%s457_s0] sm:$0xff] }
   0x2   :  { %270 = vmatprep.subr.mxu0 %v26_v0  ;;  %v24_v3 = vld [vmem:[%s458_s1 + $0x8] sm:$0xff]  ;;  %278 = vmatprep.mubr.msk.f32.mxu0 %vm34_vm0, %v21_v2  ;;  %v141_v4 = vld [vmem:[%s460_s3 + $0x78] sm:$0xff]  ;;  %v140_v5 = vld [vmem:[%s460_s3 + $0x70] sm:$0xff] }
   0x3   :  { %271 = vmatpush3.msra.mxu0 %v26_v0  ;;  %281 = vmatprep.subr.mxu1 %v141_v4 }
   0x4   :  { %272 = vmatprep.subr.mxu0 %v25_v1 }
   0x5   :  { %10 = vsyncpa [#allocation3], 0  ;;  %273 = vmatpush3.msra.mxu0 %v25_v1  ;;  %v23_v6 = vld [vmem:[%s458_s1] sm:$0xff]  ;;  %282 = vmatpush3.msra.mxu1 %v141_v4  ;;  %v139_v7 = vld [vmem:[%s460_s3 + $0x68] sm:$0xff]  ;;  %s345_s11 = smov [#allocation2]  }
   0x6   :  { %274 = vmatprep.subr.mxu0 %v24_v3  ;;  %283 = vmatprep.subr.mxu1 %v140_v5  ;;  %v22_v8 = vld [vmem:[%s457_s0 + $0x8] sm:$0xff]  ;;  %v138_v9 = vld [vmem:[%s460_s3 + $0x60] sm:$0xff]  ;;  %v137_v10 = vld [vmem:[%s460_s3 + $0x58] sm:$0xff]  ;;  %s231_s12 = sshll.u32 %s345_s11, 4  ;;  %s232_s12 = int_to_ptr.vmem [resolvable:$true] %s231_s12 }
   0x7   :  { %275 = vmatpush3.msra.mxu0 %v24_v3  ;;  %284 = vmatpush3.msra.mxu1 %v140_v5  ;;  %v136_v11 = vld [vmem:[%s460_s3 + $0x50] sm:$0xff]  ;;  %v135_v12 = vld [vmem:[%s460_s3 + $0x48] sm:$0xff]  ;;  %v134_v13 = vld [vmem:[%s460_s3 + $0x40] sm:$0xff]  ;;  %s323_s13 = scalar_lea.vmem %s232_s12, 256  ;;  %p328_p1 = scmp.lt.s32.totalorder %s232_s12, %s232_s12 }
   0x8   :  { %276 = vmatprep.subr.mxu0 %v23_v6  ;;  %285 = vmatprep.subr.mxu1 %v139_v7  ;;  %v133_v14 = vld [vmem:[%s460_s3 + $0x38] sm:$0xff]  ;;  %v132_v15 = vld [vmem:[%s460_s3 + $0x30] sm:$0xff]  ;;  %v131_v16 = vld [vmem:[%s460_s3 + $0x28] sm:$0xff]  ;;  %p324_p0 = scmp.ne.s32.totalorder %s232_s12, %s323_s13  ;;  %p329_p2 = scmp.lt.s32.totalorder %s323_s13, %s323_s13 }
   0x9   :  { %277 = vmatpush3.msra.mxu0 %v23_v6  ;;  %286 = vmatpush3.msra.mxu1 %v139_v7  ;;  %v130_v17 = vld [vmem:[%s460_s3 + $0x20] sm:$0xff]  ;;  %v129_v18 = vld [vmem:[%s460_s3 + $0x18] sm:$0xff]  ;;  %v128_v19 = vld [vmem:[%s460_s3 + $0x10] sm:$0xff] }
   0xa   :  { %279 = vmatmul.mubr.msk.f32.vlgmr.msra.gmra.mxu0 %vm34_vm0, %v22_v8  ;;  %287 = vmatprep.subr.mxu1 %v138_v9  ;;  %v127_v20 = vld [vmem:[%s460_s3 + $0x8] sm:$0xff]  ;;  %v126_v21 = vld [vmem:[%s460_s3] sm:$0xff]  ;;  %p330_p3 = por %p329_p2, %p328_p1 }
   0xb   :  { %288 = vmatpush3.msra.mxu1 %v138_v9  ;;  %v242_v22 = vld [vmem:[%s459_s2] ss:$0 sm:$0xff] }
   0xc   :  { %289 = vmatprep.subr.mxu1 %v137_v10  ;;  %v245_v37 = vld [vmem:[%s461_s4] ss:$0 sm:$0xff]  ;;  %p331_p4 = pnand %p330_p3, %p324_p0 }
   0xd   :  { %290 = vmatpush3.msra.mxu1 %v137_v10 }
   0xe   :  { %291 = vmatprep.subr.mxu1 %v136_v11 }
   0xf   :  { %292 = vmatpush3.msra.mxu1 %v136_v11 }
  0x10   :  { %293 = vmatprep.subr.mxu1 %v135_v12 }
  0x11   :  { %294 = vmatpush3.msra.mxu1 %v135_v12 }
  0x12   :  { %295 = vmatprep.subr.mxu1 %v134_v13 }
  0x13   :  { %296 = vmatpush3.msra.mxu1 %v134_v13 }
  0x14   :  { %297 = vmatprep.subr.mxu1 %v133_v14 }
  0x15   :  { %298 = vmatpush3.msra.mxu1 %v133_v14 }
  0x16   :  { %299 = vmatprep.subr.mxu1 %v132_v15 }
  0x17   :  { %300 = vmatpush3.msra.mxu1 %v132_v15 }
  0x18   :  { %301 = vmatprep.subr.mxu1 %v131_v16 }
  0x19   :  { %302 = vmatpush3.msra.mxu1 %v131_v16 }
  0x1a   :  { %303 = vmatprep.subr.mxu1 %v130_v17 }
  0x1b   :  { %304 = vmatpush3.msra.mxu1 %v130_v17 }
  0x1c   :  { %305 = vmatprep.subr.mxu1 %v129_v18 }
  0x1d   :  { %306 = vmatpush3.msra.mxu1 %v129_v18 }
  0x1e   :  { %307 = vmatprep.subr.mxu1 %v128_v19 }
  0x1f   :  { %308 = vmatpush3.msra.mxu1 %v128_v19 }
  0x20   :  { %309 = vmatprep.subr.mxu1 %v127_v20 }
  0x21   :  { %310 = vmatpush3.msra.mxu1 %v127_v20 }
  0x22   :  { %311 = vmatprep.subr.mxu1 %v126_v21 }
  0x23   :  { %312 = vmatpush3.msra.mxu1 %v126_v21 }
  0xca   :  { %v280_v23 = vpop.f32.mrf.mxu0 }
  0xcb   :  { %v113_v24 = vadd.f32 %v280_v23, %v242_v22 }
  0xcc   :  { %v107_v25 = vpop.f32.mrf.mxu0 }
  0xcd   :  { %v119_v26 = vmul.f32 0.70710677, %v113_v24  ;;  %v108_v27 = vadd.f32 %v242_v22, %v107_v25  ;;  %v117_v34 = vmul.f32 0.5, %v113_v24 }
  0xcf   :  { %319 = verf.f32 %v119_v26  ;;  %v118_v28 = vmul.f32 0.70710677, %v108_v27  ;;  %v116_v32 = vmul.f32 0.5, %v108_v27 }
  0xd1   :  { %321 = verf.f32 %v118_v28 }
  0xdc   :  { %v320_v29 = vpop.eup %319 }
  0xdd   :  { %v123_v31 = vadd.f32 1.0, %v320_v29 }
  0xde   :  { %v322_v30 = vpop.eup %321 }
  0xdf   :  { %v122_v33 = vadd.f32 1.0, %v322_v30  ;;  %v125_v36 = vmul.f32 %v123_v31, %v117_v34 }
  0xe1   :  { %v124_v35 = vmul.f32 %v122_v33, %v116_v32 }
  0xe3   :  { %313 = vmatprep.mubr.f32.mxu1 %v124_v35 }
  0xe4   :  { %314 = vmatmul.mubr.f32.vlgmr.msra.gmra.mxu1 %v125_v36 }
 0x1a4   :  { %v315_v38 = vpop.f32.mrf.mxu1 }
 0x1a5   :  { %v221_v39 = vadd.f32 %v315_v38, %v245_v37 }
 0x1a6   :  { %v215_v40 = vpop.f32.mrf.mxu1 }
 0x1a7   :  { %225 = vst.msk [vmem:[#allocation2 + $0x8] sm:$0xff] %vm34_vm0, %v221_v39  ;;  %v216_v41 = vadd.f32 %v245_v37, %v215_v40 }
 0x1a9   :  { %224 = vst.msk [vmem:[#allocation2] sm:$0xff] %vm34_vm0, %v216_v41 }
 0x1aa   :  { %334 = shalt.err (!%p331_p4)
}
 0x1ab   :  { %s346_s0 = smov 128   ;;  %s347_s4 = smov 8  }
 0x1ac   :  { %237 = dma.vmem_to_hbm [thread:$0]  %s232_s12, 256, %s462_s5, [#allocation3], %s346_s0, %s346_s0, %s347_s4  }
 0x1ad   :  { %343 = dma.done.wait [#allocation3], 256  }
 0x1ae   :  { %344 = vsyncadd [#allocation3], 4294967040 }
 0x1af   :  { %241 = vsyncpa [#allocation3], 1 }

</bundles_post_ra>
